<compile_context>
chip_gen: v7x
topology: tpu7x:2x2x1
jax: 0.10.0
libtpu: 0.0.40
codegen_flags: <defaults>
</compile_context>

<pallas_src>
import jax
import jax.numpy as jnp
from jax.experimental import pallas as pl
from jax.experimental.pallas import tpu as pltpu

LANES = 128               # vreg lane width
DEFAULT_TILE_ROWS = 4096  # (4096, 128) f32 block = 2 MiB; ~8 MiB live with dbl-buffered in+out


def _sublane_multiple(dtype) -> int:
    # Min sublane granularity for the second-to-last dim: 8 for 32-bit,
    # 16 for 16-bit, 32 for 8-bit (sub-32-bit dtypes pack along sublanes).
    itemsize = jnp.dtype(dtype).itemsize
    return max(8, 32 // itemsize)


def _round_up(x: int, m: int) -> int:
    return ((x + m - 1) // m) * m


def _linear_kernel(x_ref, params_ref, o_ref):
    # x_ref: (tile_r, 128) lane-dense block in VMEM
    # params_ref: (2,) f32 in SMEM -> [weight, bias]
    w = params_ref[0]
    b = params_ref[1]
    # Pure VPU fused multiply-add; scalar w/b broadcast for free.
    o_ref[...] = (x_ref[...] * w + b).astype(o_ref.dtype)


def linear_regression_forward(x, weight, bias, tile_rows=DEFAULT_TILE_ROWS):
    """x: (N, 1), weight: (1, 1), bias: (1,) -> (N, 1). Same math as nn.Linear(1, 1)."""
    n, in_f = x.shape
    out_f = weight.shape[0]
    assert in_f == 1 and out_f == 1, "LinearRegression module is a 1->1 linear layer"

    itemsize = jnp.dtype(x.dtype).itemsize
    sub = _sublane_multiple(x.dtype)

    # --- lane-dense repack (layout plumbing only; pad only to the next 128 multiple) ---
    flat = x.reshape(-1)                      # (N,)
    rows = pl.cdiv(n, LANES)                  # number of 128-lane rows
    padded_n = rows * LANES
    needs_pad = padded_n != n
    if needs_pad:
        flat = jnp.pad(flat, (0, padded_n - n))
    x2d = flat.reshape(rows, LANES)

    # --- tile size: large block to amortize per-step overhead, but keep >= ~4 grid
    #     steps (v7x megacore sharding), rounded to the dtype's sublane multiple ---
    target = max(sub, -(-rows // 4))          # ceil(rows / 4), at least one sublane group
    target = _round_up(target, sub)
    tile_r = min(_round_up(tile_rows, sub), target)
    grid_steps = pl.cdiv(rows, tile_r)        # ragged last tile handled by Pallas
    grid = (grid_steps,)

    # weight/bias as a tiny SMEM params array: [w, b]
    params = jnp.concatenate(
        [weight.reshape(-1), bias.reshape(-1)]
    ).astype(jnp.float32)                     # (2,)

    cost = pl.CostEstimate(
        flops=2 * padded_n,                   # one mul + one add per element
        transcendentals=0,
        bytes_accessed=2 * padded_n * itemsize,  # read x + write out
    )

    out2d = pl.pallas_call(
        _linear_kernel,
        out_shape=jax.ShapeDtypeStruct((rows, LANES), x.dtype),
        grid=grid,
        in_specs=[
            # lane-dense, tiled, double-buffered streaming input
            pl.BlockSpec((tile_r, LANES), lambda i: (i, 0)),
            # scalars in SMEM (whole tiny array, no tiling)
            pl.BlockSpec(memory_space=pltpu.MemorySpace.SMEM),
        ],
        out_specs=pl.BlockSpec((tile_r, LANES), lambda i: (i, 0)),
        compiler_params=pltpu.CompilerParams(
            # batch tiles are fully independent -> shard across cores on v7x
            dimension_semantics=("parallel",),
            # ~8 MiB of pipelined buffers at default tile; safe on v7x's 64 MiB VMEM
            vmem_limit_bytes=32 * 1024 * 1024,
        ),
        cost_estimate=cost,
    )(x2d, params)

    # Restore (N, 1); only slice when padding was actually added.
    if needs_pad:
        return out2d.reshape(-1)[:n].reshape(n, out_f)
    return out2d.reshape(n, out_f)


if __name__ == "__main__":
    key = jax.random.PRNGKey(0)
    kx, kw, kb = jax.random.split(key, 3)

    # Small shapes consistent with the module: batch=8, in_features=1, out_features=1.
    # NOTE: at N=8 the kernel is pure dispatch overhead; it only pays off for large N.
    x = jax.random.normal(kx, (8, 1), dtype=jnp.float32)
    weight = jax.random.uniform(kw, (1, 1), minval=-1.0, maxval=1.0, dtype=jnp.float32)
    bias = jax.random.uniform(kb, (1,), minval=-1.0, maxval=1.0, dtype=jnp.float32)

    out = linear_regression_forward(x, weight, bias)
    out = jax.block_until_ready(out)

    # Reference check in plain JAX.
    ref = x @ weight.T + bias
    assert out.shape == (8, 1)
    assert jnp.allclose(out, ref, atol=1e-6), "mismatch vs reference"

    print("KERNEL_OK")
</pallas_src>

<mosaic_0001>
module attributes {stable_mosaic.version = 11 : i64} {
  func.func @_linear_kernel(%arg0: i32, %arg1: memref<8x128xf32, #tpu.memory_space<vmem>>, %arg2: memref<2xf32, #tpu.memory_space<smem>>, %arg3: memref<8x128xf32, #tpu.memory_space<vmem>>) attributes {dimension_semantics = [#tpu.dimension_semantics<parallel>], iteration_bounds = array<i64: 1>, scalar_prefetch = 0 : i64, scratch_operands = 0 : i64, tpu.core_type = #tpu.core_type<tc>, window_params = [{transform_indices = @transform_0, window_bounds = array<i64: 8, 128>}, {transform_indices = @transform_1, window_bounds = array<i64: 2>}, {transform_indices = @transform_2, window_bounds = array<i64: 8, 128>}]} {
    %c0 = arith.constant 0 : index
    %0 = memref.load %arg2[%c0] : memref<2xf32, #tpu.memory_space<smem>>
    %c1 = arith.constant 1 : index
    %1 = memref.load %arg2[%c1] : memref<2xf32, #tpu.memory_space<smem>>
    %c0_0 = arith.constant 0 : index
    %c0_1 = arith.constant 0 : index
    %2 = vector.load %arg1[%c0_0, %c0_1] : memref<8x128xf32, #tpu.memory_space<vmem>>, vector<8x128xf32>
    %3 = vector.broadcast %0 : f32 to vector<8x128xf32>
    %4 = arith.mulf %2, %3 : vector<8x128xf32>
    %5 = vector.broadcast %1 : f32 to vector<8x128xf32>
    %6 = arith.addf %4, %5 : vector<8x128xf32>
    %c0_2 = arith.constant 0 : index
    %c0_3 = arith.constant 0 : index
    %7 = vector.load %arg3[%c0_2, %c0_3] : memref<8x128xf32, #tpu.memory_space<vmem>>, vector<8x128xf32>
    tpu.vector_store %arg3[%c0_2, %c0_3], %6 {strides = array<i32>} : memref<8x128xf32, #tpu.memory_space<vmem>>, vector<8x128xf32>,
    return
  }
  func.func @transform_0(%arg0: i32) -> (i32, i32) {
    %c0_i32 = arith.constant 0 : i32
    %c0_i32_0 = arith.constant 0 : i32
    return %arg0, %c0_i32 : i32, i32
  }
  func.func @transform_1(%arg0: i32) -> i32 {
    %c0_i32 = arith.constant 0 : i32
    %c0_i32_0 = arith.constant 0 : i32
    return %c0_i32 : i32
  }
  func.func @transform_2(%arg0: i32) -> (i32, i32) {
    %c0_i32 = arith.constant 0 : i32
    %c0_i32_0 = arith.constant 0 : i32
    return %arg0, %c0_i32 : i32, i32
  }
}

</mosaic_0001>

<bundles_post_ra>
// kernel: tpu_custom_call.1
= control target key start
LH: loop header
LB: loop body
LE: loop exit
PB: predicated region body
PF: predicated region fallthrough
CT: control target
= control target key end

     0   :  { %7 = vsyncpa [#allocation3], 0  ;;  %s186_s0 = inlined_call_operand.hbm [shape: f32[1,128], index: 0, kind: input, shape index: {}]   ;;  %s187_s1 = inlined_call_operand.vmem [shape: f32[2], index: 1, kind: input, shape index: {}]   ;;  %s188_s2 = inlined_call_operand.hbm [shape: f32[1,128], index: 2, kind: output, shape index: {}]  }
   0x1   :  { %8 = vsyncpa [#allocation5], 0 }
   0x2   :  { %9 = vsyncpa [#allocation4], 0 }
   0x3   :  { %14 = vsyncadd [#allocation3], 112  ;;  %s133_s9 = smov [#allocation2]   ;;  %s28_s13 = sshll.u32 %s187_s1, 4  ;;  %s29_s13 = int_to_ptr.vmem [resolvable:$true] %s28_s13 }
   0x4   :  { %s15_s10 = sshll.u32 %s133_s9, 4  ;;  %s71_s16 = scalar_lea.hbm %s186_s0, 16  ;;  %s16_s10 = int_to_ptr.vmem [resolvable:$true] %s15_s10 }
   0x5   :  { %p72_p0 = scmp.ne.s32.totalorder %s186_s0, %s71_s16  ;;  %p75_p1 = scmp.lt.u32.totalorder %s71_s16, %s186_s0 }
   0x7   :  { %p77_p2 = pnand %p75_p1, %p72_p0 }
   0x9   :  { %80 = shalt.err (!%p77_p2)
}
   0xa   :  { %s81_s21 = scalar_lea.vmem %s16_s10, 16  ;;  %s85_s22 = scalar_lea.vmem %s16_s10, 128 }
   0xb   :  { %p82_p3 = scmp.ne.s32.totalorder %s16_s10, %s81_s21  ;;  %p86_p4 = scmp.lt.s32.totalorder %s16_s10, %s16_s10 }
   0xc   :  { %p87_p5 = scmp.lt.s32.totalorder %s85_s22, %s81_s21 }
   0xe   :  { %p88_p6 = por %p87_p5, %p86_p4 }
  0x10   :  { %p89_p7 = pnand %p88_p6, %p82_p3 }
  0x12   :  { %92 = shalt.err (!%p89_p7)
}
  0x13   :  { %s134_s1 = smov 16   ;;  %s135_s23 = smov 1  }
  0x14   :  { %21 = dma.hbm_to_vmem [thread:$0]  %s186_s0, 16, %s16_s10, [#allocation3], %s134_s1, %s134_s1, %s135_s23  }
  0x15   :  { %s93_s26 = scalar_lea.vmem %s29_s13, 16  ;;  %p98_p9 = scmp.lt.s32.totalorder %s29_s13, %s29_s13 }
  0x16   :  { %p94_p8 = scmp.ne.s32.totalorder %s29_s13, %s93_s26  ;;  %p99_p10 = scmp.lt.s32.totalorder %s93_s26, %s93_s26 }
  0x18   :  { %p100_p11 = por %p99_p10, %p98_p9 }
  0x1a   :  { %p101_p12 = pnand %p100_p11, %p94_p8 }
  0x1c   :  { %104 = shalt.err (!%p101_p12)
}
  0x1d   :  { %s136_s27 = smov [#allocation6]  }
  0x1e   :  { %31 = dma.vmem_to_smem %s29_s13, 16, %s136_s27, [#allocation5]  }
  0x1f   :  { %127 = dma.done.wait [#allocation3], 128  }
  0x20   :  { %128 = vsyncadd [#allocation3], 4294967168 }
  0x21   :  { %129 = dma.done.wait [#allocation5], 16  }
  0x22   :  { %130 = vsyncadd [#allocation5], 4294967280 }
  0x23   :  { %38 = sfence }
  0x24   :  { %s39_s28 = sld [smem:[#allocation6]]  ;;  %s65_s29 = sld [smem:[#allocation6 + $0x1]]  ;;  %v41_v0 = vld [vmem:[#allocation2] sm:$0xff] }
  0x2a   :  { %v42_v1 = vstv %s39_s28  ;;  %v44_v2 = vstv %s65_s29 }
  0x2b   :  { %v43_v3 = vmul.f32 %v42_v1, %v41_v0 }
  0x2d   :  { %v45_v4 = vadd.f32 %v44_v2, %v43_v3 }
  0x2f   :  { %46 = vst [vmem:[#allocation7] sm:$0xff] %v45_v4 }
  0x30   :  { %51 = vsyncadd [#allocation4], 112  ;;  %s137_s0 = smov [#allocation7]  }
  0x31   :  { %s52_s30 = sshll.u32 %s137_s0, 4  ;;  %s53_s30 = int_to_ptr.vmem [resolvable:$true] %s52_s30 }
  0x32   :  { %s105_s3 = scalar_lea.vmem %s53_s30, 16  ;;  %s109_s4 = scalar_lea.vmem %s53_s30, 128 }
  0x33   :  { %p106_p13 = scmp.ne.s32.totalorder %s53_s30, %s105_s3  ;;  %p110_p0 = scmp.lt.s32.totalorder %s53_s30, %s53_s30 }
  0x34   :  { %p111_p1 = scmp.lt.s32.totalorder %s109_s4, %s105_s3 }
  0x36   :  { %p112_p2 = por %p111_p1, %p110_p0 }
  0x38   :  { %p113_p3 = pnand %p112_p2, %p106_p13 }
  0x3a   :  { %116 = shalt.err (!%p113_p3)
}
  0x3b   :  { %s117_s7 = scalar_lea.hbm %s188_s2, 16 }
  0x3c   :  { %p118_p4 = scmp.ne.s32.totalorder %s188_s2, %s117_s7  ;;  %p121_p5 = scmp.lt.u32.totalorder %s117_s7, %s188_s2 }
  0x3e   :  { %p123_p6 = pnand %p121_p5, %p118_p4 }
  0x40   :  { %126 = shalt.err (!%p123_p6)
}
  0x41   :  { %58 = dma.vmem_to_hbm [thread:$0]  %s53_s30, 16, %s188_s2, [#allocation4], %s134_s1, %s134_s1, %s135_s23  }
  0x42   :  { %131 = dma.done.wait [#allocation4], 128  }
  0x43   :  { %132 = vsyncadd [#allocation4], 4294967168 }
  0x44   :  { %62 = vsyncpa [#allocation3], 1 }
  0x45   :  { %63 = vsyncpa [#allocation4], 1 }
  0x46   :  { %64 = vsyncpa [#allocation5], 1 }

</bundles_post_ra>
